<compile_context>
chip_gen: v7x
topology: tpu7x:2x2x1
jax: 0.10.0
libtpu: 0.0.40
codegen_flags: <defaults>
</compile_context>

<pallas_src>
import functools

import jax
import jax.numpy as jnp
from jax import lax
from jax.experimental import pallas as pl
from jax.experimental.pallas import tpu as pltpu

LANES = 128
SUBLANES = 8
MAX_TILE_ROWS = 4096                 # (4096, 128) f32 block = 2 MiB per stream per buffer
VMEM_LIMIT_BYTES = 32 * 1024 * 1024  # explicit scoped-VMEM budget (plenty of headroom)


def _round_up(x, m):
    return (x + m - 1) // m * m


def _tensorcores_per_device():
    """Best-effort TensorCore count visible to a single Mosaic kernel.

    v5e/v6e are single-TC, where a 2-way grid split only adds a phantom block.
    v4/v5p (megacore) and v7x expose two TensorCores.
    """
    # TODO(synk): on v7x verify via xprof that the plain "parallel" axis really
    # lands on both TCs; if not, switch to pltpu.CORE_PARALLEL / pl.core_map.
    try:
        kind = jax.devices()[0].device_kind.lower()
    except Exception:
        return 1
    if any(s in kind for s in ("lite", "v5e", "v6e", "v6", "v2", "v3")):
        return 1
    if any(s in kind for s in ("v4", "v5p", "v5", "v7", "7x")):
        return 2
    return 1


def _dice_kernel(p_ref, t_ref, out_ref, acc_i, acc_s, *,
                 rows, tile_rows, steps, blocks_total, ragged_last, has_phantom):
    i = pl.program_id(0)           # core axis ("parallel")
    j = pl.program_id(1)           # reduction axis (last, "arbitrary")
    block_id = i * steps + j

    @pl.when(j == 0)
    def _init():
        acc_i[...] = jnp.zeros_like(acc_i)
        acc_s[...] = jnp.zeros_like(acc_s)

    def _accumulate(mask_rows):
        x = p_ref[...].astype(jnp.float32)
        # sigmoid(x) == 0.5*tanh(0.5*x) + 0.5 : a single EUP transcendental.
        p = 0.5 * jnp.tanh(0.5 * x) + 0.5
        t = t_ref[...].astype(jnp.float32)
        inter = p * t
        both = p + t
        if mask_rows:
            # Only the single ragged last block pays for this.  Keep it a
            # select (NOT a multiply-by-mask) so NaN/Inf produced by
            # sigmoid(garbage pad rows) is dropped.
            row0 = block_id * tile_rows
            row_idx = lax.broadcasted_iota(jnp.int32, (tile_rows, LANES), 0)
            valid = (row0 + row_idx) < rows
            inter = jnp.where(valid, inter, 0.0)
            both = jnp.where(valid, both, 0.0)
        # Register-level fold of the whole tile down to one (8, 128) vreg per
        # quantity, then a single accumulator load/store per step.
        fold = tile_rows // SUBLANES
        inter8 = jnp.sum(inter.reshape(fold, SUBLANES, LANES), axis=0)
        both8 = jnp.sum(both.reshape(fold, SUBLANES, LANES), axis=0)
        acc_i[...] += inter8
        acc_s[...] += both8

    if ragged_last:
        @pl.when(block_id < blocks_total - 1)
        def _interior():
            _accumulate(mask_rows=False)

        @pl.when(block_id == blocks_total - 1)
        def _last():
            _accumulate(mask_rows=True)
        # block_id > blocks_total - 1 (phantom) falls in neither branch: skipped.
    elif has_phantom:
        @pl.when(block_id < blocks_total)
        def _real():
            _accumulate(mask_rows=False)
    else:
        _accumulate(mask_rows=False)

    @pl.when(j == pl.num_programs(1) - 1)
    def _finalize():
        out_ref[0, 0:1, :] = jnp.sum(acc_i[...], axis=0, keepdims=True)
        out_ref[0, 1:2, :] = jnp.sum(acc_s[...], axis=0, keepdims=True)


def dice_loss(pred, targets, smooth=1.0, *, max_tile_rows=MAX_TILE_ROWS):
    """Pallas equivalent of DiceLoss.forward(pred, targets, smooth)."""
    flat_p = pred.reshape(-1)          # native dtype; cast happens in-kernel
    flat_t = targets.reshape(-1)
    n = flat_p.shape[0]

    n_kern = (n // LANES) * LANES      # lane-aligned prefix handled in-kernel
    n_tail = n - n_kern

    intersection = jnp.float32(0.0)
    denom = jnp.float32(0.0)

    if n_kern:
        p_kern = flat_p if n_kern == n else flat_p[:n_kern]
        t_kern = flat_t if n_kern == n else flat_t[:n_kern]
        rows = n_kern // LANES
        p2 = p_kern.reshape(rows, LANES)
        t2 = t_kern.reshape(rows, LANES)

        tile_rows = min(max_tile_rows, _round_up(rows, SUBLANES))
        blocks_total = pl.cdiv(rows, tile_rows)
        n_cores = max(1, min(_tensorcores_per_device(), blocks_total))
        steps = pl.cdiv(blocks_total, n_cores)
        has_phantom = n_cores * steps > blocks_total
        ragged_last = blocks_total * tile_rows != rows

        def in_index(i, j):
            # Phantom blocks (core-split remainder) are clamped onto the last
            # real block; their compute is skipped in-kernel.
            return (jnp.minimum(i * steps + j, blocks_total - 1), 0)

        tile_spec = pl.BlockSpec((tile_rows, LANES), in_index)

        itemsize_p = jnp.dtype(p2.dtype).itemsize
        itemsize_t = jnp.dtype(t2.dtype).itemsize
        cost = pl.CostEstimate(
            flops=8 * n_kern,
            transcendentals=n_kern,
            bytes_accessed=n_kern * (itemsize_p + itemsize_t)
            + n_cores * 2 * LANES * 4,
        )

        partials = pl.pallas_call(
            functools.partial(
                _dice_kernel, rows=rows, tile_rows=tile_rows, steps=steps,
                blocks_total=blocks_total, ragged_last=ragged_last,
                has_phantom=has_phantom),
            out_shape=jax.ShapeDtypeStruct((n_cores, 2, LANES), jnp.float32),
            grid_spec=pltpu.PrefetchScalarGridSpec(
                num_scalar_prefetch=0,
                grid=(n_cores, steps),
                in_specs=[tile_spec, tile_spec],
                out_specs=pl.BlockSpec((1, 2, LANES), lambda i, j: (i, 0, 0)),
                scratch_shapes=[pltpu.VMEM((SUBLANES, LANES), jnp.float32),
                                pltpu.VMEM((SUBLANES, LANES), jnp.float32)],
            ),
            compiler_params=pltpu.CompilerParams(
                dimension_semantics=("parallel", "arbitrary"),
                vmem_limit_bytes=VMEM_LIMIT_BYTES,
            ),
            cost_estimate=cost,
        )(p2, t2)

        intersection = intersection + jnp.sum(partials[:, 0, :])
        denom = denom + jnp.sum(partials[:, 1, :])   # sum(sigmoid(pred)) + sum(targets)

    if n_tail:
        # Sub-lane remainder (< 128 elements): negligible, reduced with plain
        # jnp so no wrapper-side pad copy of the full inputs is ever made.
        tail_p = jax.nn.sigmoid(flat_p[n_kern:].astype(jnp.float32))
        tail_t = flat_t[n_kern:].astype(jnp.float32)
        intersection = intersection + jnp.sum(tail_p * tail_t)
        denom = denom + jnp.sum(tail_p) + jnp.sum(tail_t)

    dice = (2.0 * intersection + jnp.float32(smooth)) / (denom + jnp.float32(smooth))
    return 1.0 - dice


def _dice_loss_ref(pred, targets, smooth=1.0):
    p = jax.nn.sigmoid(pred.astype(jnp.float32)).reshape(-1)
    t = targets.astype(jnp.float32).reshape(-1)
    inter = jnp.sum(p * t)
    dice = (2.0 * inter + smooth) / (jnp.sum(p) + jnp.sum(t) + smooth)
    return 1.0 - dice


if __name__ == "__main__":
    key = jax.random.PRNGKey(0)
    k1, k2, k3, k4, k5, k6 = jax.random.split(key, 6)

    # 1) Lane-aligned segmentation-head shape: N=2, C=4, H=W=16 (NCHW).
    pred = jax.random.normal(k1, (2, 4, 16, 16), dtype=jnp.float32)
    targets = (jax.random.uniform(k2, (2, 4, 16, 16)) > 0.5).astype(jnp.float32)
    loss = dice_loss(pred, targets, smooth=1.0)
    jax.block_until_ready(loss)
    ref = _dice_loss_ref(pred, targets, smooth=1.0)
    assert jnp.allclose(loss, ref, atol=1e-5, rtol=1e-5), (loss, ref)

    # 2) Ragged total size (510 = 3*128 + 126): exercises the in-kernel row
    #    mask on the partial block plus the <128-element jnp tail path.
    pred_r = jax.random.normal(k3, (2, 3, 17, 5), dtype=jnp.float32)
    targets_r = (jax.random.uniform(k4, (2, 3, 17, 5)) > 0.5).astype(jnp.float32)
    loss_r = dice_loss(pred_r, targets_r, smooth=1.0)
    jax.block_until_ready(loss_r)
    ref_r = _dice_loss_ref(pred_r, targets_r, smooth=1.0)
    assert jnp.allclose(loss_r, ref_r, atol=1e-5, rtol=1e-5), (loss_r, ref_r)

    # 3) Multi-block grid (tiny tile override) — exercises multi-step
    #    accumulation and, on 2-TC chips, the phantom-block skip; bf16 inputs
    #    exercise the in-kernel dtype cast.
    pred_m = jax.random.normal(k5, (3, 8, 128), dtype=jnp.bfloat16)
    targets_m = (jax.random.uniform(k6, (3, 8, 128)) > 0.5).astype(jnp.bfloat16)
    loss_m = dice_loss(pred_m, targets_m, smooth=1.0, max_tile_rows=8)
    jax.block_until_ready(loss_m)
    ref_m = _dice_loss_ref(pred_m, targets_m, smooth=1.0)
    assert jnp.allclose(loss_m, ref_m, atol=1e-4, rtol=1e-4), (loss_m, ref_m)

    print("KERNEL_OK")
</pallas_src>

<mosaic_0001>
module attributes {stable_mosaic.version = 11 : i64} {
  func.func @_dice_kernel(%arg0: i32, %arg1: i32, %arg2: memref<16x128xf32, #tpu.memory_space<vmem>>, %arg3: memref<16x128xf32, #tpu.memory_space<vmem>>, %arg4: memref<1x2x128xf32, #tpu.memory_space<vmem>>, %arg5: memref<8x128xf32, #tpu.memory_space<vmem>>, %arg6: memref<8x128xf32, #tpu.memory_space<vmem>>) attributes {dimension_semantics = [#tpu.dimension_semantics<parallel>, #tpu.dimension_semantics<arbitrary>], iteration_bounds = array<i64: 1, 1>, scalar_prefetch = 0 : i64, scratch_operands = 2 : i64, tpu.core_type = #tpu.core_type<tc>, window_params = [{transform_indices = @transform_0, window_bounds = array<i64: 16, 128>}, {transform_indices = @transform_1, window_bounds = array<i64: 16, 128>}, {transform_indices = @transform_2, window_bounds = array<i64: 1, 2, 128>}]} {
    %c0_i32 = arith.constant 0 : i32
    %0 = arith.cmpi eq, %arg1, %c0_i32 : i32
    %1 = arith.extui %0 : i1 to i32
    %c0_i32_0 = arith.constant 0 : i32
    %2 = arith.cmpi ne, %1, %c0_i32_0 : i32
    scf.if %2 {
      %cst_18 = arith.constant 0.000000e+00 : f32
      %27 = vector.broadcast %cst_18 : f32 to vector<8x128xf32>
      %c0_19 = arith.constant 0 : index
      %c0_20 = arith.constant 0 : index
      %28 = vector.load %arg5[%c0_19, %c0_20] : memref<8x128xf32, #tpu.memory_space<vmem>>, vector<8x128xf32>
      tpu.vector_store %arg5[%c0_19, %c0_20], %27 {strides = array<i32>} : memref<8x128xf32, #tpu.memory_space<vmem>>, vector<8x128xf32>,
      %cst_21 = arith.constant 0.000000e+00 : f32
      %29 = vector.broadcast %cst_21 : f32 to vector<8x128xf32>
      %c0_22 = arith.constant 0 : index
      %c0_23 = arith.constant 0 : index
      %30 = vector.load %arg6[%c0_22, %c0_23] : memref<8x128xf32, #tpu.memory_space<vmem>>, vector<8x128xf32>
      tpu.vector_store %arg6[%c0_22, %c0_23], %29 {strides = array<i32>} : memref<8x128xf32, #tpu.memory_space<vmem>>, vector<8x128xf32>,
    } else {
    }
    %c0 = arith.constant 0 : index
    %c0_1 = arith.constant 0 : index
    %3 = vector.load %arg2[%c0, %c0_1] : memref<16x128xf32, #tpu.memory_space<vmem>>, vector<16x128xf32>
    %cst = arith.constant 5.000000e-01 : f32
    %4 = vector.broadcast %cst : f32 to vector<16x128xf32>
    %5 = arith.mulf %4, %3 : vector<16x128xf32>
    %6 = math.tanh %5 : vector<16x128xf32>
    %cst_2 = arith.constant 5.000000e-01 : f32
    %7 = vector.broadcast %cst_2 : f32 to vector<16x128xf32>
    %8 = arith.mulf %7, %6 : vector<16x128xf32>
    %cst_3 = arith.constant 5.000000e-01 : f32
    %9 = vector.broadcast %cst_3 : f32 to vector<16x128xf32>
    %10 = arith.addf %8, %9 : vector<16x128xf32>
    %c0_4 = arith.constant 0 : index
    %c0_5 = arith.constant 0 : index
    %11 = vector.load %arg3[%c0_4, %c0_5] : memref<16x128xf32, #tpu.memory_space<vmem>>, vector<16x128xf32>
    %12 = arith.mulf %10, %11 : vector<16x128xf32>
    %13 = arith.addf %10, %11 : vector<16x128xf32>
    %14 = vector.shape_cast %12 : vector<16x128xf32> to vector<2x8x128xf32>
    %cst_6 = arith.constant dense<0.000000e+00> : vector<8x128xf32>
    %15 = vector.multi_reduction <add>, %14, %cst_6 [0] : vector<2x8x128xf32> to vector<8x128xf32>
    %16 = vector.shape_cast %13 : vector<16x128xf32> to vector<2x8x128xf32>
    %cst_7 = arith.constant dense<0.000000e+00> : vector<8x128xf32>
    %17 = vector.multi_reduction <add>, %16, %cst_7 [0] : vector<2x8x128xf32> to vector<8x128xf32>
    %c0_8 = arith.constant 0 : index
    %c0_9 = arith.constant 0 : index
    %18 = vector.load %arg5[%c0_8, %c0_9] : memref<8x128xf32, #tpu.memory_space<vmem>>, vector<8x128xf32>
    %19 = arith.addf %18, %15 : vector<8x128xf32>
    %c0_10 = arith.constant 0 : index
    %c0_11 = arith.constant 0 : index
    %20 = vector.load %arg5[%c0_10, %c0_11] : memref<8x128xf32, #tpu.memory_space<vmem>>, vector<8x128xf32>
    tpu.vector_store %arg5[%c0_10, %c0_11], %19 {strides = array<i32>} : memref<8x128xf32, #tpu.memory_space<vmem>>, vector<8x128xf32>,
    %c0_12 = arith.constant 0 : index
    %c0_13 = arith.constant 0 : index
    %21 = vector.load %arg6[%c0_12, %c0_13] : memref<8x128xf32, #tpu.memory_space<vmem>>, vector<8x128xf32>
    %22 = arith.addf %21, %17 : vector<8x128xf32>
    %c0_14 = arith.constant 0 : index
    %c0_15 = arith.constant 0 : index
    %23 = vector.load %arg6[%c0_14, %c0_15] : memref<8x128xf32, #tpu.memory_space<vmem>>, vector<8x128xf32>
    tpu.vector_store %arg6[%c0_14, %c0_15], %22 {strides = array<i32>} : memref<8x128xf32, #tpu.memory_space<vmem>>, vector<8x128xf32>,
    %c0_i32_16 = arith.constant 0 : i32
    %24 = arith.cmpi eq, %arg1, %c0_i32_16 : i32
    %25 = arith.extui %24 : i1 to i32
    %c0_i32_17 = arith.constant 0 : i32
    %26 = arith.cmpi ne, %25, %c0_i32_17 : i32
    scf.if %26 {
      %c0_18 = arith.constant 0 : index
      %c0_19 = arith.constant 0 : index
      %27 = vector.load %arg5[%c0_18, %c0_19] : memref<8x128xf32, #tpu.memory_space<vmem>>, vector<8x128xf32>
      %cst_20 = arith.constant dense<0.000000e+00> : vector<128xf32>
      %28 = vector.multi_reduction <add>, %27, %cst_20 [0] : vector<8x128xf32> to vector<128xf32>
      %29 = vector.shape_cast %28 : vector<128xf32> to vector<1x128xf32>
      %c0_21 = arith.constant 0 : index
      %c0_22 = arith.constant 0 : index
      %c0_23 = arith.constant 0 : index
      %30 = vector.load %arg4[%c0_21, %c0_22, %c0_23] : memref<1x2x128xf32, #tpu.memory_space<vmem>>, vector<1x1x128xf32>
      %31 = vector.shape_cast %30 : vector<1x1x128xf32> to vector<1x128xf32>
      %32 = vector.shape_cast %29 : vector<1x128xf32> to vector<1x1x128xf32>
      tpu.vector_store %arg4[%c0_21, %c0_22, %c0_23], %32 {strides = array<i32>} : memref<1x2x128xf32, #tpu.memory_space<vmem>>, vector<1x1x128xf32>,
      %c0_24 = arith.constant 0 : index
      %c0_25 = arith.constant 0 : index
      %33 = vector.load %arg6[%c0_24, %c0_25] : memref<8x128xf32, #tpu.memory_space<vmem>>, vector<8x128xf32>
      %cst_26 = arith.constant dense<0.000000e+00> : vector<128xf32>
      %34 = vector.multi_reduction <add>, %33, %cst_26 [0] : vector<8x128xf32> to vector<128xf32>
      %35 = vector.shape_cast %34 : vector<128xf32> to vector<1x128xf32>
      %c0_27 = arith.constant 0 : index
      %c1 = arith.constant 1 : index
      %c0_28 = arith.constant 0 : index
      %36 = vector.load %arg4[%c0_27, %c1, %c0_28] : memref<1x2x128xf32, #tpu.memory_space<vmem>>, vector<1x1x128xf32>
      %37 = vector.shape_cast %36 : vector<1x1x128xf32> to vector<1x128xf32>
      %38 = vector.shape_cast %35 : vector<1x128xf32> to vector<1x1x128xf32>
      tpu.vector_store %arg4[%c0_27, %c1, %c0_28], %38 {strides = array<i32>} : memref<1x2x128xf32, #tpu.memory_space<vmem>>, vector<1x1x128xf32>,
    } else {
    }
    return
  }
  func.func @transform_0(%arg0: i32, %arg1: i32) -> (i32, i32) {
    %c1_i32 = arith.constant 1 : i32
    %0 = arith.muli %arg0, %c1_i32 : i32
    %1 = arith.addi %0, %arg1 : i32
    %c0_i32 = arith.constant 0 : i32
    %2 = arith.minsi %1, %c0_i32 : i32
    %c0_i32_0 = arith.constant 0 : i32
    %c0_i32_1 = arith.constant 0 : i32
    return %2, %c0_i32_0 : i32, i32
  }
  func.func @transform_1(%arg0: i32, %arg1: i32) -> (i32, i32) {
    %c1_i32 = arith.constant 1 : i32
    %0 = arith.muli %arg0, %c1_i32 : i32
    %1 = arith.addi %0, %arg1 : i32
    %c0_i32 = arith.constant 0 : i32
    %2 = arith.minsi %1, %c0_i32 : i32
    %c0_i32_0 = arith.constant 0 : i32
    %c0_i32_1 = arith.constant 0 : i32
    return %2, %c0_i32_0 : i32, i32
  }
  func.func @transform_2(%arg0: i32, %arg1: i32) -> (i32, i32, i32) {
    %c0_i32 = arith.constant 0 : i32
    %c0_i32_0 = arith.constant 0 : i32
    %c0_i32_1 = arith.constant 0 : i32
    return %arg0, %c0_i32, %c0_i32_0 : i32, i32, i32
  }
}

</mosaic_0001>

<bundles_post_ra>
// kernel: tpu_custom_call.1
= control target key start
LH: loop header
LB: loop body
LE: loop exit
PB: predicated region body
PF: predicated region fallthrough
CT: control target
= control target key end

     0   :  { %7 = vsyncpa [#allocation5], 0  ;;  %s266_s0 = inlined_call_operand.hbm [shape: f32[16,128], index: 0, kind: input, shape index: {}]   ;;  %s267_s1 = inlined_call_operand.hbm [shape: f32[16,128], index: 1, kind: input, shape index: {}]   ;;  %s268_s2 = inlined_call_operand.hbm [shape: f32[1,2,128], index: 2, kind: output, shape index: {}]  }
   0x1   :  { %8 = vsyncpa [#allocation8], 0 }
   0x2   :  { %9 = vsyncpa [#allocation6], 0  ;;  %s210_s9 = smov [#allocation4]   ;;  %s138_s13 = scalar_lea.hbm %s266_s0, 256 }
   0x3   :  { %s21_s10 = sshll.u32 %s210_s9, 4  ;;  %p139_p0 = scmp.ne.s32.totalorder %s266_s0, %s138_s13  ;;  %s22_s10 = int_to_ptr.vmem [resolvable:$true] %s21_s10 }
   0x4   :  { %p142_p1 = scmp.lt.u32.totalorder %s138_s13, %s266_s0 }
   0x6   :  { %p144_p2 = pnand %p142_p1, %p139_p0 }
   0x8   :  { %147 = shalt.err (!%p144_p2)
}
   0x9   :  { %s148_s18 = scalar_lea.vmem %s22_s10, 256  ;;  %p153_p4 = scmp.lt.s32.totalorder %s22_s10, %s22_s10 }
   0xa   :  { %p149_p3 = scmp.ne.s32.totalorder %s22_s10, %s148_s18  ;;  %p154_p5 = scmp.lt.s32.totalorder %s148_s18, %s148_s18 }
   0xc   :  { %p155_p6 = por %p154_p5, %p153_p4 }
   0xe   :  { %p156_p7 = pnand %p155_p6, %p149_p3 }
  0x10   :  { %159 = shalt.err (!%p156_p7)
}
  0x11   :  { %s211_s19 = smov 128   ;;  %s212_s20 = smov 8  }
  0x12   :  { %27 = dma.hbm_to_vmem [thread:$0]  %s266_s0, 256, %s22_s10, [#allocation5], %s211_s19, %s211_s19, %s212_s20  }
  0x13   :  { %s213_s23 = smov [#allocation7]   ;;  %s160_s27 = scalar_lea.hbm %s267_s1, 256 }
  0x14   :  { %s39_s24 = sshll.u32 %s213_s23, 4  ;;  %p161_p8 = scmp.ne.s32.totalorder %s267_s1, %s160_s27  ;;  %s40_s24 = int_to_ptr.vmem [resolvable:$true] %s39_s24 }
  0x15   :  { %p164_p9 = scmp.lt.u32.totalorder %s160_s27, %s267_s1 }
  0x17   :  { %p166_p10 = pnand %p164_p9, %p161_p8 }
  0x19   :  { %169 = shalt.err (!%p166_p10)
}
  0x1a   :  { %s170_s4 = scalar_lea.vmem %s40_s24, 256  ;;  %p175_p12 = scmp.lt.s32.totalorder %s40_s24, %s40_s24 }
  0x1b   :  { %p171_p11 = scmp.ne.s32.totalorder %s40_s24, %s170_s4  ;;  %p176_p13 = scmp.lt.s32.totalorder %s170_s4, %s170_s4 }
  0x1d   :  { %p177_p0 = por %p176_p13, %p175_p12 }
  0x1f   :  { %p178_p1 = pnand %p177_p0, %p171_p11 }
  0x21   :  { %181 = shalt.err (!%p178_p1)
}
  0x22   :  { %45 = dma.hbm_to_vmem [thread:$0]  %s267_s1, 256, %s40_s24, [#allocation8], %s211_s19, %s211_s19, %s212_s20  }
  0x23   :  { %204 = dma.done.wait [#allocation5], 256  }
  0x24   :  { %205 = vsyncadd [#allocation5], 4294967040 }
  0x25   :  { %206 = dma.done.wait [#allocation8], 256  }
  0x26   :  { %207 = vsyncadd [#allocation8], 4294967040  ;;  %v66_v0 = vld [vmem:[#allocation4] sm:$0xff]  ;;  %v67_v1 = vld [vmem:[#allocation4 + $0x8] sm:$0xff]  ;;  %s214_s1 = smov [#allocation9]  }
  0x27   :  { %v68_v2 = vmul.f32 0.5, %v66_v0  ;;  %v69_v3 = vmul.f32 0.5, %v67_v1  ;;  %v76_v8 = vld [vmem:[#allocation7] sm:$0xff]  ;;  %v77_v10 = vld [vmem:[#allocation7 + $0x8] sm:$0xff]  ;;  %s115_s6 = sshll.u32 %s214_s1, 4  ;;  %s116_s6 = int_to_ptr.vmem [resolvable:$true] %s115_s6 }
  0x28   :  { %s182_s7 = scalar_lea.vmem %s116_s6, 32  ;;  %p187_p3 = scmp.lt.s32.totalorder %s116_s6, %s116_s6 }
  0x29   :  { %134 = vtanh.f32 %v68_v2  ;;  %p183_p2 = scmp.ne.s32.totalorder %s116_s6, %s182_s7  ;;  %p188_p4 = scmp.lt.s32.totalorder %s182_s7, %s182_s7 }
  0x2a   :  { %136 = vtanh.f32 %v69_v3 }
  0x2b   :  { %p189_p5 = por %p188_p4, %p187_p3 }
  0x2d   :  { %p190_p6 = pnand %p189_p5, %p183_p2 }
  0x33   :  { %v135_v4 = vpop.eup %134 }
  0x34   :  { %v137_v5 = vpop.eup %136  ;;  %v72_v6 = vmul.f32 0.5, %v135_v4 }
  0x35   :  { %v73_v7 = vmul.f32 0.5, %v137_v5 }
  0x36   :  { %v74_v9 = vadd.f32 0.5, %v72_v6 }
  0x37   :  { %v75_v11 = vadd.f32 0.5, %v73_v7 }
  0x38   :  { %v78_v12 = vmul.f32 %v76_v8, %v74_v9  ;;  %v80_v13 = vadd.f32 %v76_v8, %v74_v9 }
  0x39   :  { %v79_v14 = vmul.f32 %v77_v10, %v75_v11  ;;  %v81_v15 = vadd.f32 %v77_v10, %v75_v11 }
  0x3b   :  { %v82_v16 = vadd.f32 %v79_v14, %v78_v12  ;;  %v83_v17 = vadd.f32 %v81_v15, %v80_v13 }
  0x3d   :  { %v94_v18 = vrot.slane %v82_v16, 4  ;;  %v102_v19 = vrot.slane %v83_v17, 4 }
  0x3f   :  { %v95_v20 = vadd.f32 %v94_v18, %v82_v16  ;;  %v103_v21 = vadd.f32 %v102_v19, %v83_v17 }
  0x41   :  { %v96_v22 = vrot.slane %v95_v20, 2  ;;  %v104_v23 = vrot.slane %v103_v21, 2 }
  0x43   :  { %v97_v24 = vadd.f32 %v96_v22, %v95_v20  ;;  %v105_v25 = vadd.f32 %v104_v23, %v103_v21 }
  0x45   :  { %v98_v26 = vrot.slane %v97_v24, 1  ;;  %v106_v27 = vrot.slane %v105_v25, 1 }
  0x47   :  { %v99_v28 = vadd.f32 %v98_v26, %v97_v24  ;;  %v107_v29 = vadd.f32 %v106_v27, %v105_v25 }
  0x49   :  { %100 = vst [vmem:[#allocation9] sm:$0x1] %v99_v28  ;;  %108 = vst [vmem:[#allocation9 + $0x1] sm:$0x1] %v107_v29 }
  0x4a   :  { %193 = shalt.err (!%p190_p6)
}
  0x4b   :  { %s194_s10 = scalar_lea.hbm %s268_s2, 32 }
  0x4c   :  { %p195_p7 = scmp.ne.s32.totalorder %s268_s2, %s194_s10  ;;  %p198_p8 = scmp.lt.u32.totalorder %s194_s10, %s268_s2 }
  0x4e   :  { %p200_p9 = pnand %p198_p8, %p195_p7 }
  0x50   :  { %203 = shalt.err (!%p200_p9)
}
  0x51   :  { %118 = dma.vmem_to_hbm [thread:$0]  %s116_s6, 32, %s268_s2, [#allocation6]  }
  0x52   :  { %208 = dma.done.wait [#allocation6], 32  }
  0x53   :  { %209 = vsyncadd [#allocation6], 4294967264 }
  0x54   :  { %122 = vsyncpa [#allocation5], 1 }
  0x55   :  { %123 = vsyncpa [#allocation8], 1 }
  0x56   :  { %124 = vsyncpa [#allocation6], 1 }

</bundles_post_ra>
